<compile_context>
chip_gen: v7x
topology: tpu7x:2x2x1
jax: 0.10.0
libtpu: 0.0.40
codegen_flags: <defaults>
</compile_context>

<pallas_src>
import jax
import jax.numpy as jnp
from jax.experimental import pallas as pl
from jax.experimental.pallas import tpu as pltpu


def _round_up(x, m):
    return ((x + m - 1) // m) * m


def _mlp_kernel(x_ref, w1_ref, b1_ref, w2_ref, b2_ref, o_ref):
    # Hidden layer: x @ W1 + b1, ReLU.
    # x arrives as f32 (single HBM read); cast to bf16 in VMEM for the MXU.
    x = x_ref[...].astype(jnp.bfloat16)                                # (TB, D)
    h = jnp.dot(x, w1_ref[...], preferred_element_type=jnp.float32)    # (TB, Hp) f32
    h = jnp.maximum(h + b1_ref[...], 0.0)
    # Output layer: h @ W2 + b2, Sigmoid.  W2 is f32 (tiny), so the second
    # matmul runs in f32 and avoids a second bf16 quantization of h.
    z = jnp.dot(h, w2_ref[...], preferred_element_type=jnp.float32)    # (TB, Cp) f32
    o_ref[...] = jax.nn.sigmoid(z + b2_ref[...]).astype(o_ref.dtype)


def prepare_params(w1, b1, w2, b2, *, lane=128, w1_dtype=jnp.bfloat16):
    """One-time parameter re-layout (call at load time, NOT per forward).

    w1 : (num_params, D)        PyTorch Linear layout (out, in)
    b1 : (num_params,)
    w2 : (num_classes, num_params)
    b2 : (num_classes,)

    Returns ((w1_t, b1_2d, w2_t, b2_2d), num_classes) with:
      * weights transposed to (in, out),
      * the hidden dim padded to a multiple of 128 lanes (Hp),
      * the class dim padded to a multiple of 128 lanes (Cp),
      * W1 cast to bf16 (dominant HBM stream), W2/biases kept f32.
    Padded hidden columns are zero (ReLU(0)=0) and the matching W2 rows are
    zero, so padding does not change the result; padded class columns produce
    sigmoid(0)=0.5 and are sliced away by the wrapper.
    """
    H, D = w1.shape
    C = w2.shape[0]
    Hp = _round_up(max(H, lane), lane)
    Cp = _round_up(max(C, lane), lane)

    w1_t = jnp.zeros((D, Hp), w1_dtype).at[:, :H].set(
        jnp.asarray(w1, w1_dtype).T)                                   # (D, Hp)
    b1_2d = jnp.zeros((1, Hp), jnp.float32).at[0, :H].set(
        jnp.asarray(b1, jnp.float32))                                  # (1, Hp)
    w2_t = jnp.zeros((Hp, Cp), jnp.float32).at[:H, :C].set(
        jnp.asarray(w2, jnp.float32).T)                                # (Hp, Cp)
    b2_2d = jnp.zeros((1, Cp), jnp.float32).at[0, :C].set(
        jnp.asarray(b2, jnp.float32))                                  # (1, Cp)
    return (w1_t, b1_2d, w2_t, b2_2d), C


def _pick_batch_tile(B, D, Hp, Cp, tb):
    """Batch tile: multiple of 8 sublanes, >=2 grid steps for v7x megacore,
    capped by a conservative VMEM budget (v7x has 64 MiB / 32 MiB scoped)."""
    TB = _round_up(min(tb, _round_up(B, 8)), 8)
    # v7x has 2 TensorCores; make sure mid/large batches give the parallel
    # grid axis at least 2 steps so both cores do work.
    if B >= 16 and pl.cdiv(B, TB) < 2:
        TB = _round_up(pl.cdiv(B, 2), 8)

    # Resident weights (single-buffered) + per-tile buffers.
    weight_bytes = D * Hp * 2 + Hp * Cp * 4 + Hp * 4 + Cp * 4

    def tile_bytes(t):
        return (2 * t * D * 4      # x tile, f32, double-buffered
                + 2 * t * Cp * 4   # out tile, f32, double-buffered
                + t * Hp * 4       # h intermediate, f32
                + t * D * 2)       # bf16 copy of the x tile

    budget = 24 * 1024 * 1024
    while TB > 8 and weight_bytes + tile_bytes(TB) > budget:
        TB = max(8, _round_up(TB // 2, 8))
    # Note: for very large D (= seq*dim) where W1 itself approaches the VMEM
    # budget, a K-grid over D with an f32 accumulator (P3 pattern) would be
    # needed; not required for this module's typical sizes.
    return TB


def multilabel_classifier_2d(x, params, num_classes, *, tb=512, trim_output=True):
    """Forward pass of MultilabelClassifier2D.

    x          : (B, seq, dim) or (B, D) float32
    params     : output of prepare_params (pre-transposed / padded weights)
    num_classes: real class count (params carry a lane-padded class dim)
    trim_output: if False, return the padded (B, Cp) array (valid region is
                 [:, :num_classes]) and skip the post-call slice copy.
    returns (B, num_classes) float32 in [0, 1]   (padded (B, Cp) if not trimmed)
    """
    w1_t, b1_2d, w2_t, b2_2d = params
    B = x.shape[0]
    x2d = x.reshape(B, -1)            # == torch .view(B, -1); stays f32
    D = x2d.shape[1]
    Hp = w1_t.shape[1]
    Cp = w2_t.shape[1]
    assert w1_t.shape[0] == D, "feature dim mismatch between x and W1"

    TB = _pick_batch_tile(B, D, Hp, Cp, tb)
    grid = (pl.cdiv(B, TB),)          # partial last block handled by Pallas

    def call(single_buffer_weights):
        # Weights/biases have constant index maps -> fetched once; single
        # buffering halves their resident VMEM footprint.
        wmode = ({"pipeline_mode": pl.Buffered(1)}
                 if single_buffer_weights else {})
        return pl.pallas_call(
            _mlp_kernel,
            out_shape=jax.ShapeDtypeStruct((B, Cp), jnp.float32),
            grid=grid,
            in_specs=[
                pl.BlockSpec((TB, D), lambda i: (i, 0)),            # x tile
                pl.BlockSpec((D, Hp), lambda i: (0, 0), **wmode),   # W1 (bf16)
                pl.BlockSpec((1, Hp), lambda i: (0, 0), **wmode),   # b1
                pl.BlockSpec((Hp, Cp), lambda i: (0, 0), **wmode),  # W2 (f32)
                pl.BlockSpec((1, Cp), lambda i: (0, 0), **wmode),   # b2
            ],
            out_specs=pl.BlockSpec((TB, Cp), lambda i: (i, 0)),
            compiler_params=pltpu.CompilerParams(
                dimension_semantics=("parallel",)),
        )(x2d, w1_t, b1_2d, w2_t, b2_2d)

    try:
        out = call(True)
    except Exception:
        # Fallback for jax builds where pipeline_mode=Buffered(1) is rejected;
        # identical semantics, default double-buffered weights.
        out = call(False)

    if trim_output and num_classes != Cp:
        out = out[:, :num_classes]
    return out


if __name__ == "__main__":
    # Small shapes consistent with the module's forward:
    # sequence_length=8, input_dim=16 -> flattened feature dim D=128,
    # num_params=256 hidden units, num_classes=8, batch=2.
    B, SEQ, DIM = 2, 8, 16
    NUM_PARAMS, NUM_CLASSES = 256, 8
    D = SEQ * DIM

    key = jax.random.PRNGKey(0)
    kx, kw1, kb1, kw2, kb2 = jax.random.split(key, 5)

    x = jax.random.normal(kx, (B, SEQ, DIM), dtype=jnp.float32)
    # Deterministic synthetic parameters (PyTorch Linear layout: (out, in)).
    w1 = jax.random.normal(kw1, (NUM_PARAMS, D), dtype=jnp.float32) * 0.05
    b1 = jax.random.normal(kb1, (NUM_PARAMS,), dtype=jnp.float32) * 0.05
    w2 = jax.random.normal(kw2, (NUM_CLASSES, NUM_PARAMS), dtype=jnp.float32) * 0.05
    b2 = jax.random.normal(kb2, (NUM_CLASSES,), dtype=jnp.float32) * 0.05

    # One-time parameter preparation (transpose + lane padding + bf16 W1).
    params, num_classes = prepare_params(w1, b1, w2, b2)

    out = multilabel_classifier_2d(x, params, num_classes)
    out = jax.block_until_ready(out)

    # Pure-JAX f32 reference of the same forward.
    ref = jax.nn.sigmoid(
        jnp.maximum(x.reshape(B, -1) @ w1.T + b1, 0.0) @ w2.T + b2
    )
    assert out.shape == (B, NUM_CLASSES)
    # bf16 x/W1 in the first layer -> relaxed tolerance on sigmoid outputs.
    assert jnp.allclose(out, ref, atol=2e-2, rtol=2e-2)

    print("KERNEL_OK")
</pallas_src>

<mosaic_0001>
module attributes {stable_mosaic.version = 11 : i64} {
  func.func @_mlp_kernel(%arg0: i32, %arg1: memref<8x128xf32, #tpu.memory_space<vmem>>, %arg2: memref<128x256xbf16, #tpu.memory_space<vmem>>, %arg3: memref<1x256xf32, #tpu.memory_space<vmem>>, %arg4: memref<256x128xf32, #tpu.memory_space<vmem>>, %arg5: memref<1x128xf32, #tpu.memory_space<vmem>>, %arg6: memref<8x128xf32, #tpu.memory_space<vmem>>) attributes {dimension_semantics = [#tpu.dimension_semantics<parallel>], iteration_bounds = array<i64: 1>, scalar_prefetch = 0 : i64, scratch_operands = 0 : i64, tpu.core_type = #tpu.core_type<tc>, window_params = [{transform_indices = @transform_0, window_bounds = array<i64: 8, 128>}, {pipeline_mode = #tpu.pipeline_mode<synchronous>, transform_indices = @transform_1, window_bounds = array<i64: 128, 256>}, {pipeline_mode = #tpu.pipeline_mode<synchronous>, transform_indices = @transform_2, window_bounds = array<i64: 1, 256>}, {pipeline_mode = #tpu.pipeline_mode<synchronous>, transform_indices = @transform_3, window_bounds = array<i64: 256, 128>}, {pipeline_mode = #tpu.pipeline_mode<synchronous>, transform_indices = @transform_4, window_bounds = array<i64: 1, 128>}, {transform_indices = @transform_5, window_bounds = array<i64: 8, 128>}]} {
    %c0 = arith.constant 0 : index
    %c0_0 = arith.constant 0 : index
    %0 = vector.load %arg1[%c0, %c0_0] : memref<8x128xf32, #tpu.memory_space<vmem>>, vector<8x128xf32>
    %1 = arith.truncf %0 : vector<8x128xf32> to vector<8x128xbf16>
    %c0_1 = arith.constant 0 : index
    %c0_2 = arith.constant 0 : index
    %2 = vector.load %arg2[%c0_1, %c0_2] : memref<128x256xbf16, #tpu.memory_space<vmem>>, vector<128x256xbf16>
    %cst = arith.constant dense<0.000000e+00> : vector<8x256xf32>
    %3 = tpu.matmul %1, %2, %cst {dimension_numbers = #tpu.dot_dimension_numbers<[1], [0], [0], [1], [0, 0, 1, 1], [], []>} : vector<8x128xbf16>, vector<128x256xbf16>, vector<8x256xf32> -> vector<8x256xf32>
    %c0_3 = arith.constant 0 : index
    %c0_4 = arith.constant 0 : index
    %4 = vector.load %arg3[%c0_3, %c0_4] : memref<1x256xf32, #tpu.memory_space<vmem>>, vector<1x256xf32>
    %5 = vector.broadcast %4 : vector<1x256xf32> to vector<8x256xf32>
    %6 = arith.addf %3, %5 : vector<8x256xf32>
    %cst_5 = arith.constant 0.000000e+00 : f32
    %7 = vector.broadcast %cst_5 : f32 to vector<8x256xf32>
    %8 = arith.maximumf %6, %7 : vector<8x256xf32>
    %c0_6 = arith.constant 0 : index
    %c0_7 = arith.constant 0 : index
    %9 = vector.load %arg4[%c0_6, %c0_7] : memref<256x128xf32, #tpu.memory_space<vmem>>, vector<256x128xf32>
    %cst_8 = arith.constant dense<0.000000e+00> : vector<8x128xf32>
    %10 = tpu.matmul %8, %9, %cst_8 {dimension_numbers = #tpu.dot_dimension_numbers<[1], [0], [0], [1], [0, 0, 1, 1], [], []>} : vector<8x256xf32>, vector<256x128xf32>, vector<8x128xf32> -> vector<8x128xf32>
    %c0_9 = arith.constant 0 : index
    %c0_10 = arith.constant 0 : index
    %11 = vector.load %arg5[%c0_9, %c0_10] : memref<1x128xf32, #tpu.memory_space<vmem>>, vector<1x128xf32>
    %12 = vector.broadcast %11 : vector<1x128xf32> to vector<8x128xf32>
    %13 = arith.addf %10, %12 : vector<8x128xf32>
    %14 = arith.negf %13 : vector<8x128xf32>
    %15 = math.exp %14 : vector<8x128xf32>
    %cst_11 = arith.constant 1.000000e+00 : f32
    %16 = vector.broadcast %cst_11 : f32 to vector<8x128xf32>
    %17 = arith.addf %16, %15 : vector<8x128xf32>
    %18 = arith.divf %16, %17 : vector<8x128xf32>
    %c0_12 = arith.constant 0 : index
    %c0_13 = arith.constant 0 : index
    %19 = vector.load %arg6[%c0_12, %c0_13] : memref<8x128xf32, #tpu.memory_space<vmem>>, vector<8x128xf32>
    tpu.vector_store %arg6[%c0_12, %c0_13], %18 {strides = array<i32>} : memref<8x128xf32, #tpu.memory_space<vmem>>, vector<8x128xf32>,
    return
  }
  func.func @transform_0(%arg0: i32) -> (i32, i32) {
    %c0_i32 = arith.constant 0 : i32
    %c0_i32_0 = arith.constant 0 : i32
    return %arg0, %c0_i32 : i32, i32
  }
  func.func @transform_1(%arg0: i32) -> (i32, i32) {
    %c0_i32 = arith.constant 0 : i32
    %c0_i32_0 = arith.constant 0 : i32
    %c0_i32_1 = arith.constant 0 : i32
    return %c0_i32, %c0_i32_0 : i32, i32
  }
  func.func @transform_2(%arg0: i32) -> (i32, i32) {
    %c0_i32 = arith.constant 0 : i32
    %c0_i32_0 = arith.constant 0 : i32
    %c0_i32_1 = arith.constant 0 : i32
    return %c0_i32, %c0_i32_0 : i32, i32
  }
  func.func @transform_3(%arg0: i32) -> (i32, i32) {
    %c0_i32 = arith.constant 0 : i32
    %c0_i32_0 = arith.constant 0 : i32
    %c0_i32_1 = arith.constant 0 : i32
    return %c0_i32, %c0_i32_0 : i32, i32
  }
  func.func @transform_4(%arg0: i32) -> (i32, i32) {
    %c0_i32 = arith.constant 0 : i32
    %c0_i32_0 = arith.constant 0 : i32
    %c0_i32_1 = arith.constant 0 : i32
    return %c0_i32, %c0_i32_0 : i32, i32
  }
  func.func @transform_5(%arg0: i32) -> (i32, i32) {
    %c0_i32 = arith.constant 0 : i32
    %c0_i32_0 = arith.constant 0 : i32
    return %arg0, %c0_i32 : i32, i32
  }
}

module attributes {stable_mosaic.version = 11 : i64} {
  func.func @_mlp_kernel(%arg0: i32, %arg1: memref<8x128xf32, #tpu.memory_space<vmem>>, %arg2: memref<128x256xbf16, #tpu.memory_space<vmem>>, %arg3: memref<1x256xf32, #tpu.memory_space<vmem>>, %arg4: memref<256x128xf32, #tpu.memory_space<vmem>>, %arg5: memref<1x128xf32, #tpu.memory_space<vmem>>, %arg6: memref<8x128xf32, #tpu.memory_space<vmem>>) attributes {dimension_semantics = [#tpu.dimension_semantics<parallel>], iteration_bounds = array<i64: 1>, scalar_prefetch = 0 : i64, scratch_operands = 0 : i64, tpu.core_type = #tpu.core_type<tc>, window_params = [{transform_indices = @transform_0, window_bounds = array<i64: 8, 128>}, {pipeline_mode = #tpu.pipeline_mode<synchronous>, transform_indices = @transform_1, window_bounds = array<i64: 128, 256>}, {pipeline_mode = #tpu.pipeline_mode<synchronous>, transform_indices = @transform_2, window_bounds = array<i64: 1, 256>}, {pipeline_mode = #tpu.pipeline_mode<synchronous>, transform_indices = @transform_3, window_bounds = array<i64: 256, 128>}, {pipeline_mode = #tpu.pipeline_mode<synchronous>, transform_indices = @transform_4, window_bounds = array<i64: 1, 128>}, {transform_indices = @transform_5, window_bounds = array<i64: 8, 128>}]} {
    %c0 = arith.constant 0 : index
    %c0_0 = arith.constant 0 : index
    %0 = vector.load %arg1[%c0, %c0_0] : memref<8x128xf32, #tpu.memory_space<vmem>>, vector<8x128xf32>
    %1 = arith.truncf %0 : vector<8x128xf32> to vector<8x128xbf16>
    %c0_1 = arith.constant 0 : index
    %c0_2 = arith.constant 0 : index
    %2 = vector.load %arg2[%c0_1, %c0_2] : memref<128x256xbf16, #tpu.memory_space<vmem>>, vector<128x256xbf16>
    %cst = arith.constant dense<0.000000e+00> : vector<8x256xf32>
    %3 = tpu.matmul %1, %2, %cst {dimension_numbers = #tpu.dot_dimension_numbers<[1], [0], [0], [1], [0, 0, 1, 1], [], []>} : vector<8x128xbf16>, vector<128x256xbf16>, vector<8x256xf32> -> vector<8x256xf32>
    %c0_3 = arith.constant 0 : index
    %c0_4 = arith.constant 0 : index
    %4 = vector.load %arg3[%c0_3, %c0_4] : memref<1x256xf32, #tpu.memory_space<vmem>>, vector<1x256xf32>
    %5 = vector.broadcast %4 : vector<1x256xf32> to vector<8x256xf32>
    %6 = arith.addf %3, %5 : vector<8x256xf32>
    %cst_5 = arith.constant 0.000000e+00 : f32
    %7 = vector.broadcast %cst_5 : f32 to vector<8x256xf32>
    %8 = arith.maximumf %6, %7 : vector<8x256xf32>
    %c0_6 = arith.constant 0 : index
    %c0_7 = arith.constant 0 : index
    %9 = vector.load %arg4[%c0_6, %c0_7] : memref<256x128xf32, #tpu.memory_space<vmem>>, vector<256x128xf32>
    %cst_8 = arith.constant dense<0.000000e+00> : vector<8x128xf32>
    %10 = tpu.matmul %8, %9, %cst_8 {dimension_numbers = #tpu.dot_dimension_numbers<[1], [0], [0], [1], [0, 0, 1, 1], [], []>} : vector<8x256xf32>, vector<256x128xf32>, vector<8x128xf32> -> vector<8x128xf32>
    %c0_9 = arith.constant 0 : index
    %c0_10 = arith.constant 0 : index
    %11 = vector.load %arg5[%c0_9, %c0_10] : memref<1x128xf32, #tpu.memory_space<vmem>>, vector<1x128xf32>
    %12 = vector.broadcast %11 : vector<1x128xf32> to vector<8x128xf32>
    %13 = arith.addf %10, %12 : vector<8x128xf32>
    %14 = arith.negf %13 : vector<8x128xf32>
    %15 = math.exp %14 : vector<8x128xf32>
    %cst_11 = arith.constant 1.000000e+00 : f32
    %16 = vector.broadcast %cst_11 : f32 to vector<8x128xf32>
    %17 = arith.addf %16, %15 : vector<8x128xf32>
    %18 = arith.divf %16, %17 : vector<8x128xf32>
    %c0_12 = arith.constant 0 : index
    %c0_13 = arith.constant 0 : index
    %19 = vector.load %arg6[%c0_12, %c0_13] : memref<8x128xf32, #tpu.memory_space<vmem>>, vector<8x128xf32>
    tpu.vector_store %arg6[%c0_12, %c0_13], %18 {strides = array<i32>} : memref<8x128xf32, #tpu.memory_space<vmem>>, vector<8x128xf32>,
    return
  }
  func.func @transform_0(%arg0: i32) -> (i32, i32) {
    %c0_i32 = arith.constant 0 : i32
    %c0_i32_0 = arith.constant 0 : i32
    return %arg0, %c0_i32 : i32, i32
  }
  func.func @transform_1(%arg0: i32) -> (i32, i32) {
    %c0_i32 = arith.constant 0 : i32
    %c0_i32_0 = arith.constant 0 : i32
    %c0_i32_1 = arith.constant 0 : i32
    return %c0_i32, %c0_i32_0 : i32, i32
  }
  func.func @transform_2(%arg0: i32) -> (i32, i32) {
    %c0_i32 = arith.constant 0 : i32
    %c0_i32_0 = arith.constant 0 : i32
    %c0_i32_1 = arith.constant 0 : i32
    return %c0_i32, %c0_i32_0 : i32, i32
  }
  func.func @transform_3(%arg0: i32) -> (i32, i32) {
    %c0_i32 = arith.constant 0 : i32
    %c0_i32_0 = arith.constant 0 : i32
    %c0_i32_1 = arith.constant 0 : i32
    return %c0_i32, %c0_i32_0 : i32, i32
  }
  func.func @transform_4(%arg0: i32) -> (i32, i32) {
    %c0_i32 = arith.constant 0 : i32
    %c0_i32_0 = arith.constant 0 : i32
    %c0_i32_1 = arith.constant 0 : i32
    return %c0_i32, %c0_i32_0 : i32, i32
  }
  func.func @transform_5(%arg0: i32) -> (i32, i32) {
    %c0_i32 = arith.constant 0 : i32
    %c0_i32_0 = arith.constant 0 : i32
    return %arg0, %c0_i32 : i32, i32
  }
}

</mosaic_0001>

<bundles_post_ra>
// kernel: tpu_custom_call.1
= control target key start
LH: loop header
LB: loop body
LE: loop exit
PB: predicated region body
PF: predicated region fallthrough
CT: control target
= control target key end

     0   :  { %10 = vsyncpa [#allocation3], 0  ;;  %s671_s0 = inlined_call_operand.hbm [shape: f32[2,128], index: 0, kind: input, shape index: {}]   ;;  %s672_s1 = inlined_call_operand.hbm [shape: bf16[128,256], index: 1, kind: input, shape index: {}]   ;;  %s673_s2 = inlined_call_operand.vmem [shape: f32[1,256], index: 2, kind: input, shape index: {}]   ;;  %s674_s3 = inlined_call_operand.hbm [shape: f32[256,128], index: 3, kind: input, shape index: {}]   ;;  %s675_s4 = inlined_call_operand.vmem [shape: f32[1,128], index: 4, kind: input, shape index: {}]   ;;  %s676_s5 = inlined_call_operand.hbm [shape: f32[2,128], index: 5, kind: output, shape index: {}]  }
   0x1   :  { %11 = vsyncpa [#allocation6], 0 }
   0x2   :  { %12 = vsyncpa [#allocation4], 0 }
   0x3   :  { %17 = vsyncadd [#allocation3], 96  ;;  %s566_s18 = smov [#allocation5]   ;;  %s472_s22 = scalar_lea.hbm %s672_s1, 2048 }
   0x4   :  { %s30_s19 = sshll.u32 %s566_s18, 4  ;;  %p473_p0 = scmp.ne.s32.totalorder %s672_s1, %s472_s22  ;;  %s31_s19 = int_to_ptr.vmem [resolvable:$true] %s30_s19 }
   0x5   :  { %p476_p1 = scmp.lt.u32.totalorder %s472_s22, %s672_s1 }
   0x7   :  { %p478_p2 = pnand %p476_p1, %p473_p0 }
   0x9   :  { %481 = shalt.err (!%p478_p2)
}
   0xa   :  { %s482_s27 = scalar_lea.vmem %s31_s19, 2048  ;;  %p487_p4 = scmp.lt.s32.totalorder %s31_s19, %s31_s19 }
   0xb   :  { %p483_p3 = scmp.ne.s32.totalorder %s31_s19, %s482_s27  ;;  %p488_p5 = scmp.lt.s32.totalorder %s482_s27, %s482_s27 }
   0xd   :  { %p489_p6 = por %p488_p5, %p487_p4 }
   0xf   :  { %p490_p7 = pnand %p489_p6, %p483_p3 }
  0x11   :  { %493 = shalt.err (!%p490_p7)
}
  0x12   :  { %s567_s28 = smov 128   ;;  %s568_s29 = smov 8  }
  0x13   :  { %36 = dma.hbm_to_vmem [thread:$0]  %s672_s1, 2048, %s31_s19, [#allocation6], %s567_s28, %s567_s28, %s568_s29  }
  0x14   :  { %s569_s7 = smov [#allocation2]   ;;  %s494_s11 = scalar_lea.hbm %s671_s0, 32 }
  0x15   :  { %s18_s8 = sshll.u32 %s569_s7, 4  ;;  %p495_p8 = scmp.ne.s32.totalorder %s671_s0, %s494_s11  ;;  %s19_s8 = int_to_ptr.vmem [resolvable:$true] %s18_s8 }
  0x16   :  { %p498_p9 = scmp.lt.u32.totalorder %s494_s11, %s671_s0 }
  0x18   :  { %p500_p10 = pnand %p498_p9, %p495_p8 }
  0x1a   :  { %503 = shalt.err (!%p500_p10)
}
  0x1b   :  { %s504_s16 = scalar_lea.vmem %s19_s8, 32  ;;  %s508_s1 = scalar_lea.vmem %s19_s8, 128 }
  0x1c   :  { %p505_p11 = scmp.ne.s32.totalorder %s19_s8, %s504_s16  ;;  %p509_p12 = scmp.lt.s32.totalorder %s19_s8, %s19_s8 }
  0x1d   :  { %p510_p13 = scmp.lt.s32.totalorder %s508_s1, %s504_s16 }
  0x1f   :  { %p511_p0 = por %p510_p13, %p509_p12 }
  0x21   :  { %p512_p1 = pnand %p511_p0, %p505_p11 }
  0x23   :  { %515 = shalt.err (!%p512_p1)
}
  0x24   :  { %s570_s17 = smov 32   ;;  %s571_s18 = smov 2  }
  0x25   :  { %24 = dma.hbm_to_vmem [thread:$0]  %s671_s0, 32, %s19_s8, [#allocation3], %s570_s17, %s570_s17, %s571_s18  }
  0x26   :  { %s572_s21 = smov [#allocation7]   ;;  %s516_s25 = scalar_lea.hbm %s674_s3, 4096 }
  0x27   :  { %s44_s22 = sshll.u32 %s572_s21, 4  ;;  %p517_p2 = scmp.ne.s32.totalorder %s674_s3, %s516_s25  ;;  %s45_s22 = int_to_ptr.vmem [resolvable:$true] %s44_s22 }
  0x28   :  { %p520_p3 = scmp.lt.u32.totalorder %s516_s25, %s674_s3 }
  0x2a   :  { %p522_p4 = pnand %p520_p3, %p517_p2 }
  0x2c   :  { %525 = shalt.err (!%p522_p4)
}
  0x2d   :  { %s526_s7 = scalar_lea.vmem %s45_s22, 4096  ;;  %p531_p6 = scmp.lt.s32.totalorder %s45_s22, %s45_s22 }
  0x2e   :  { %p527_p5 = scmp.ne.s32.totalorder %s45_s22, %s526_s7  ;;  %p532_p7 = scmp.lt.s32.totalorder %s526_s7, %s526_s7 }
  0x30   :  { %p533_p8 = por %p532_p7, %p531_p6 }
  0x32   :  { %p534_p9 = pnand %p533_p8, %p527_p5 }
  0x34   :  { %537 = shalt.err (!%p534_p9)
}
  0x35   :  { %50 = dma.hbm_to_vmem [thread:$0]  %s674_s3, 4096, %s45_s22, [#allocation6], %s567_s28, %s567_s28, %s568_s29  }
  0x36   :  { %560 = dma.done.wait [#allocation3], 128  }
  0x37   :  { %561 = vsyncadd [#allocation3], 4294967168 }
  0x38   :  { %562 = dma.done.wait [#allocation6], 6144  }
  0x39   :  { %563 = vsyncadd [#allocation6], 4294961152  ;;  %v573_v0 = vmov 0   ;;  %v444_v1 = vld [vmem:[#allocation5 + $0x4] ss:$8 sps:$4 sm:$0xff]   ;;  %v234_v15 = vld [vmem:[#allocation7 + $0x90] sm:$0xff] }
  0x3a   :  { %205 = vmatprep.mubr.bf16.mxu0 %v573_v0  ;;  %v446_v2 = vld [vmem:[#allocation5] ss:$8 sps:$4 sm:$0xff]   ;;  %173 = vmatprep.subr.bf16.mxu0 %v444_v1  ;;  %v447_v3 = vld [vmem:[#allocation5 + $0x14] ss:$8 sps:$4 sm:$0xff]   ;;  %v449_v4 = vld [vmem:[#allocation5 + $0x10] ss:$8 sps:$4 sm:$0xff]  }
  0x3b   :  { %174 = vmatpush1.bf16.msra.mxu0 %v446_v2  ;;  %v450_v5 = vld [vmem:[#allocation5 + $0x24] ss:$8 sps:$4 sm:$0xff]   ;;  %v452_v6 = vld [vmem:[#allocation5 + $0x20] ss:$8 sps:$4 sm:$0xff]   ;;  %v453_v7 = vld [vmem:[#allocation5 + $0x34] ss:$8 sps:$4 sm:$0xff]  }
  0x3c   :  { %175 = vmatprep.subr.bf16.mxu0 %v447_v3  ;;  %v455_v8 = vld [vmem:[#allocation5 + $0x30] ss:$8 sps:$4 sm:$0xff]   ;;  %v456_v9 = vld [vmem:[#allocation5 + $0x44] ss:$8 sps:$4 sm:$0xff]   ;;  %v458_v23 = vld [vmem:[#allocation5 + $0x40] ss:$8 sps:$4 sm:$0xff]   ;;  %v83_v3 = vlaneseq }
  0x3d   :  { %v232_v10 = vld [vmem:[#allocation7 + $0x80] sm:$0xff]  ;;  %v233_v11 = vld [vmem:[#allocation7 + $0x88] sm:$0xff]  ;;  %v235_v16 = vld [vmem:[#allocation7 + $0x98] sm:$0xff] }
  0x3e   :  { %v216_v12 = vld [vmem:[#allocation7] sm:$0xff]  ;;  %v403_v13 = vpack.c.bf16 %v233_v11, %v232_v10  ;;  %v217_v14 = vld [vmem:[#allocation7 + $0x8] sm:$0xff]  ;;  %v407_v18 = vpack.c.bf16 %v235_v16, %v234_v15  ;;  %v218_v19 = vld [vmem:[#allocation7 + $0x10] sm:$0xff] }
  0x3f   :  { %176 = vmatpush1.bf16.msra.mxu0 %v449_v4  ;;  %v405_v17 = vpack.c.bf16 %v217_v14, %v216_v12  ;;  %v219_v20 = vld [vmem:[#allocation7 + $0x18] sm:$0xff]  ;;  %v236_v21 = vld [vmem:[#allocation7 + $0xa0] sm:$0xff]  ;;  %v237_v22 = vld [vmem:[#allocation7 + $0xa8] sm:$0xff]  ;;  %v84_v4 = vshrl.u32 %v83_v3, 7 }
  0x40   :  { %177 = vmatprep.subr.bf16.mxu0 %v450_v5  ;;  %404 = vmatprep.subr.bf16.mxu1 %v403_v13  ;;  %v409_v24 = vpack.c.bf16 %v219_v20, %v218_v19  ;;  %v459_v25 = vld [vmem:[#allocation5 + $0x54] ss:$8 sps:$4 sm:$0xff]   ;;  %v411_v26 = vpack.c.bf16 %v237_v22, %v236_v21  ;;  %v220_v27 = vld [vmem:[#allocation7 + $0x20] sm:$0xff]  ;;  %v221_v28 = vld [vmem:[#allocation7 + $0x28] sm:$0xff] }
  0x41   :  { %406 = vmatpush3.bf16.msra.mxu1 %v405_v17  ;;  %v238_v29 = vld [vmem:[#allocation7 + $0xb0] sm:$0xff]  ;;  %v239_v30 = vld [vmem:[#allocation7 + $0xb8] sm:$0xff]  ;;  %v413_v32 = vpack.c.bf16 %v221_v28, %v220_v27  ;;  %v462_v33 = vld [vmem:[#allocation5 + $0x64] ss:$8 sps:$4 sm:$0xff]   ;;  %v85_v5 = vsub.s32 0, %v84_v4 }
  0x42   :  { %408 = vmatprep.subr.bf16.mxu1 %v407_v18  ;;  %v461_v31 = vld [vmem:[#allocation5 + $0x50] ss:$8 sps:$4 sm:$0xff]   ;;  %v415_v34 = vpack.c.bf16 %v239_v30, %v238_v29  ;;  %v240_v37 = vld [vmem:[#allocation7 + $0xc0] sm:$0xff]  ;;  %v241_v38 = vld [vmem:[#allocation7 + $0xc8] sm:$0xff] }
  0x43   :  { %178 = vmatpush1.bf16.msra.mxu0 %v452_v6  ;;  %v222_v35 = vld [vmem:[#allocation7 + $0x30] sm:$0xff]  ;;  %v223_v36 = vld [vmem:[#allocation7 + $0x38] sm:$0xff]  ;;  %v464_v39 = vld [vmem:[#allocation5 + $0x60] ss:$8 sps:$4 sm:$0xff]   ;;  %v419_v42 = vpack.c.bf16 %v241_v38, %v240_v37 }
  0x44   :  { %179 = vmatprep.subr.bf16.mxu0 %v453_v7  ;;  %v417_v40 = vpack.c.bf16 %v223_v36, %v222_v35  ;;  %v465_v41 = vld [vmem:[#allocation5 + $0x74] ss:$8 sps:$4 sm:$0xff]   ;;  %v224_v43 = vld [vmem:[#allocation7 + $0x40] sm:$0xff]  ;;  %v225_v44 = vld [vmem:[#allocation7 + $0x48] sm:$0xff]  ;;  %v89_v7 = vsub.s32 1, %v84_v4 }
  0x45   :  { %410 = vmatpush3.bf16.msra.mxu1 %v409_v24  ;;  %v242_v45 = vld [vmem:[#allocation7 + $0xd0] sm:$0xff]  ;;  %v243_v46 = vld [vmem:[#allocation7 + $0xd8] sm:$0xff]  ;;  %v421_v49 = vpack.c.bf16 %v225_v44, %v224_v43  ;;  %v244_v53 = vld [vmem:[#allocation7 + $0xe0] sm:$0xff] }
  0x46   :  { %412 = vmatprep.subr.bf16.mxu1 %v411_v26  ;;  %v467_v47 = vld [vmem:[#allocation5 + $0x70] ss:$8 sps:$4 sm:$0xff]   ;;  %v423_v50 = vpack.c.bf16 %v243_v46, %v242_v45  ;;  %v245_v54 = vld [vmem:[#allocation7 + $0xe8] sm:$0xff]  ;;  %v228_v58 = vld [vmem:[#allocation7 + $0x60] sm:$0xff] }
  0x47   :  { %180 = vmatpush1.bf16.msra.mxu0 %v455_v8  ;;  %v63_v48 = vld [vmem:[#allocation2] sm:$0xff]  ;;  %v226_v51 = vld [vmem:[#allocation7 + $0x50] sm:$0xff]  ;;  %v427_v57 = vpack.c.bf16 %v245_v54, %v244_v53  ;;  %v229_v59 = vld [vmem:[#allocation7 + $0x68] sm:$0xff] }
  0x48   :  { %181 = vmatprep.subr.bf16.mxu0 %v456_v9  ;;  %v227_v52 = vld [vmem:[#allocation7 + $0x58] sm:$0xff]  ;;  %v64_v55 = vpack.c.bf16 %v63_v48, %v63_v48  ;;  %v429_v60 = vpack.c.bf16 %v229_v59, %v228_v58  ;;  %v246_v61 = vld [vmem:[#allocation7 + $0xf0] sm:$0xff] }
  0x49   :  { %414 = vmatpush3.bf16.msra.mxu1 %v413_v32  ;;  %v425_v56 = vpack.c.bf16 %v227_v52, %v226_v51  ;;  %v247_v62 = vld [vmem:[#allocation7 + $0xf8] sm:$0xff]  ;;  %v230_v0 = vld [vmem:[#allocation7 + $0x70] sm:$0xff] }
  0x4a   :  { %416 = vmatprep.subr.bf16.mxu1 %v415_v34  ;;  %v431_v63 = vpack.c.bf16 %v247_v62, %v246_v61  ;;  %v231_v1 = vld [vmem:[#allocation7 + $0x78] sm:$0xff] }
  0x4b   :  { %182 = vmatpush1.bf16.msra.mxu0 %v458_v23  ;;  %v433_v2 = vpack.c.bf16 %v231_v1, %v230_v0  ;;  %v81_v6 = vld [vmem:[%s673_s2] sm:$0x3] }
  0x4c   :  { %183 = vmatprep.subr.bf16.mxu0 %v459_v25  ;;  %v86_v8 = vrot.slane %v81_v6, %v85_v5  ;;  %v90_v9 = vrot.slane %v81_v6, %v89_v7  ;;  %v366_v19 = vld [vmem:[%s675_s4] ss:$0 sm:$0xff] }
  0x4d   :  { %418 = vmatpush3.bf16.msra.mxu1 %v417_v40 }
  0x4e   :  { %420 = vmatprep.subr.bf16.mxu1 %v419_v42 }
  0x4f   :  { %184 = vmatpush1.bf16.msra.mxu0 %v461_v31 }
  0x50   :  { %185 = vmatprep.subr.bf16.mxu0 %v462_v33 }
  0x51   :  { %422 = vmatpush3.bf16.msra.mxu1 %v421_v49 }
  0x52   :  { %424 = vmatprep.subr.bf16.mxu1 %v423_v50 }
  0x53   :  { %186 = vmatpush1.bf16.msra.mxu0 %v464_v39 }
  0x54   :  { %187 = vmatprep.subr.bf16.mxu0 %v465_v41 }
  0x55   :  { %426 = vmatpush3.bf16.msra.mxu1 %v425_v56 }
  0x56   :  { %428 = vmatprep.subr.bf16.mxu1 %v427_v57 }
  0x57   :  { %188 = vmatpush1.bf16.msra.mxu0 %v467_v47 }
  0x59   :  { %430 = vmatpush3.bf16.msra.mxu1 %v429_v60 }
  0x5a   :  { %206 = vmatmul.mubr.bf16.vlgmr.msra.gmra.mrb[0].mxu0 %v64_v55  ;;  %432 = vmatprep.subr.bf16.mxu1 %v431_v63 }
  0x5d   :  { %434 = vmatpush3.bf16.msra.mxu1 %v433_v2 }
 0x12d   :  { %v207_v10 = vpop.f32.mrb[0].mxu0 }
 0x12e   :  { %v208_v11 = vadd.f32 %v207_v10, %v86_v8  ;;  %v209_v12 = vpop.f32.mrb[1].mxu0 }
 0x12f   :  { %v211_v13 = vpop.f32.mrb[2].mxu0  ;;  %v210_v14 = vadd.f32 %v209_v12, %v90_v9 }
 0x130   :  { %v212_v15 = vpop.f32.mrb[3].mxu0  ;;  %v214_v17 = vmax.f32 %v208_v11, 0.0 }
 0x131   :  { %v215_v16 = vmax.f32 %v210_v14, 0.0 }
 0x133   :  { %319 = vmatprep.mubr.f32.mxu1 %v215_v16 }
 0x134   :  { %320 = vmatmul.mubr.f32.vlgmr.msra.gmra.mrb[0].mxu1 %v214_v17 }
 0x207   :  { %v400_v18 = vpop.f32.mrb[0].mxu1 }
 0x208   :  { %v401_v20 = vpop.f32.mrb[1].mxu1 }
 0x209   :  { %v402_v21 = vadd.f32 %v401_v20, %v400_v18 }
 0x20b   :  { %v322_v22 = vadd.f32 %v402_v21, %v366_v19 }
 0x20d   :  { %v367_v23 = vmul.f32 -1.442695, %v322_v22 }
 0x20f   :  { %468 = vpow2.f32 %v367_v23 }
 0x219   :  { %v469_v24 = vpop.eup %468 }
 0x21a   :  { %v328_v25 = vadd.f32 1.0, %v469_v24 }
 0x21c   :  { %470 = vrcp.f32 %v328_v25 }
 0x226   :  { %v471_v26 = vpop.eup %470 }
 0x227   :  { %331 = vst [vmem:[#allocation8] sm:$0xff] %v471_v26 }
 0x228   :  { %336 = vsyncadd [#allocation4], 96  ;;  %s574_s2 = smov [#allocation8]  }
 0x229   :  { %s337_s10 = sshll.u32 %s574_s2, 4  ;;  %s338_s10 = int_to_ptr.vmem [resolvable:$true] %s337_s10 }
 0x22a   :  { %s538_s11 = scalar_lea.vmem %s338_s10, 32  ;;  %s542_s12 = scalar_lea.vmem %s338_s10, 128 }
 0x22b   :  { %p539_p10 = scmp.ne.s32.totalorder %s338_s10, %s538_s11  ;;  %p543_p11 = scmp.lt.s32.totalorder %s338_s10, %s338_s10 }
 0x22c   :  { %p544_p12 = scmp.lt.s32.totalorder %s542_s12, %s538_s11 }
 0x22e   :  { %p545_p13 = por %p544_p12, %p543_p11 }
 0x230   :  { %p546_p0 = pnand %p545_p13, %p539_p10 }
 0x232   :  { %549 = shalt.err (!%p546_p0)
}
 0x233   :  { %s550_s14 = scalar_lea.hbm %s676_s5, 32 }
 0x234   :  { %p551_p1 = scmp.ne.s32.totalorder %s676_s5, %s550_s14  ;;  %p554_p2 = scmp.lt.u32.totalorder %s550_s14, %s676_s5 }
 0x236   :  { %p556_p3 = pnand %p554_p2, %p551_p1 }
 0x238   :  { %559 = shalt.err (!%p556_p3)
}
 0x239   :  { %343 = dma.vmem_to_hbm [thread:$0]  %s338_s10, 32, %s676_s5, [#allocation4], %s570_s17, %s570_s17, %s571_s18  }
 0x23a   :  { %564 = dma.done.wait [#allocation4], 128  }
 0x23b   :  { %565 = vsyncadd [#allocation4], 4294967168 }
 0x23c   :  { %347 = vsyncpa [#allocation3], 1 }
 0x23d   :  { %348 = vsyncpa [#allocation6], 1 }
 0x23e   :  { %349 = vsyncpa [#allocation4], 1 }

// kernel: tpu_custom_call.1
= control target key start
LH: loop header
LB: loop body
LE: loop exit
PB: predicated region body
PF: predicated region fallthrough
CT: control target
= control target key end

     0   :  { %10 = vsyncpa [#allocation3], 0  ;;  %s671_s0 = inlined_call_operand.hbm [shape: f32[2,128], index: 0, kind: input, shape index: {}]   ;;  %s672_s1 = inlined_call_operand.hbm [shape: bf16[128,256], index: 1, kind: input, shape index: {}]   ;;  %s673_s2 = inlined_call_operand.vmem [shape: f32[1,256], index: 2, kind: input, shape index: {}]   ;;  %s674_s3 = inlined_call_operand.hbm [shape: f32[256,128], index: 3, kind: input, shape index: {}]   ;;  %s675_s4 = inlined_call_operand.vmem [shape: f32[1,128], index: 4, kind: input, shape index: {}]   ;;  %s676_s5 = inlined_call_operand.hbm [shape: f32[2,128], index: 5, kind: output, shape index: {}]  }
   0x1   :  { %11 = vsyncpa [#allocation6], 0 }
   0x2   :  { %12 = vsyncpa [#allocation4], 0 }
   0x3   :  { %17 = vsyncadd [#allocation3], 96  ;;  %s566_s18 = smov [#allocation5]   ;;  %s472_s22 = scalar_lea.hbm %s672_s1, 2048 }
   0x4   :  { %s30_s19 = sshll.u32 %s566_s18, 4  ;;  %p473_p0 = scmp.ne.s32.totalorder %s672_s1, %s472_s22  ;;  %s31_s19 = int_to_ptr.vmem [resolvable:$true] %s30_s19 }
   0x5   :  { %p476_p1 = scmp.lt.u32.totalorder %s472_s22, %s672_s1 }
   0x7   :  { %p478_p2 = pnand %p476_p1, %p473_p0 }
   0x9   :  { %481 = shalt.err (!%p478_p2)
}
   0xa   :  { %s482_s27 = scalar_lea.vmem %s31_s19, 2048  ;;  %p487_p4 = scmp.lt.s32.totalorder %s31_s19, %s31_s19 }
   0xb   :  { %p483_p3 = scmp.ne.s32.totalorder %s31_s19, %s482_s27  ;;  %p488_p5 = scmp.lt.s32.totalorder %s482_s27, %s482_s27 }
   0xd   :  { %p489_p6 = por %p488_p5, %p487_p4 }
   0xf   :  { %p490_p7 = pnand %p489_p6, %p483_p3 }
  0x11   :  { %493 = shalt.err (!%p490_p7)
}
  0x12   :  { %s567_s28 = smov 128   ;;  %s568_s29 = smov 8  }
  0x13   :  { %36 = dma.hbm_to_vmem [thread:$0]  %s672_s1, 2048, %s31_s19, [#allocation6], %s567_s28, %s567_s28, %s568_s29  }
  0x14   :  { %s569_s7 = smov [#allocation2]   ;;  %s494_s11 = scalar_lea.hbm %s671_s0, 32 }
  0x15   :  { %s18_s8 = sshll.u32 %s569_s7, 4  ;;  %p495_p8 = scmp.ne.s32.totalorder %s671_s0, %s494_s11  ;;  %s19_s8 = int_to_ptr.vmem [resolvable:$true] %s18_s8 }
  0x16   :  { %p498_p9 = scmp.lt.u32.totalorder %s494_s11, %s671_s0 }
  0x18   :  { %p500_p10 = pnand %p498_p9, %p495_p8 }
  0x1a   :  { %503 = shalt.err (!%p500_p10)
}
  0x1b   :  { %s504_s16 = scalar_lea.vmem %s19_s8, 32  ;;  %s508_s1 = scalar_lea.vmem %s19_s8, 128 }
  0x1c   :  { %p505_p11 = scmp.ne.s32.totalorder %s19_s8, %s504_s16  ;;  %p509_p12 = scmp.lt.s32.totalorder %s19_s8, %s19_s8 }
  0x1d   :  { %p510_p13 = scmp.lt.s32.totalorder %s508_s1, %s504_s16 }
  0x1f   :  { %p511_p0 = por %p510_p13, %p509_p12 }
  0x21   :  { %p512_p1 = pnand %p511_p0, %p505_p11 }
  0x23   :  { %515 = shalt.err (!%p512_p1)
}
  0x24   :  { %s570_s17 = smov 32   ;;  %s571_s18 = smov 2  }
  0x25   :  { %24 = dma.hbm_to_vmem [thread:$0]  %s671_s0, 32, %s19_s8, [#allocation3], %s570_s17, %s570_s17, %s571_s18  }
  0x26   :  { %s572_s21 = smov [#allocation7]   ;;  %s516_s25 = scalar_lea.hbm %s674_s3, 4096 }
  0x27   :  { %s44_s22 = sshll.u32 %s572_s21, 4  ;;  %p517_p2 = scmp.ne.s32.totalorder %s674_s3, %s516_s25  ;;  %s45_s22 = int_to_ptr.vmem [resolvable:$true] %s44_s22 }
  0x28   :  { %p520_p3 = scmp.lt.u32.totalorder %s516_s25, %s674_s3 }
  0x2a   :  { %p522_p4 = pnand %p520_p3, %p517_p2 }
  0x2c   :  { %525 = shalt.err (!%p522_p4)
}
  0x2d   :  { %s526_s7 = scalar_lea.vmem %s45_s22, 4096  ;;  %p531_p6 = scmp.lt.s32.totalorder %s45_s22, %s45_s22 }
  0x2e   :  { %p527_p5 = scmp.ne.s32.totalorder %s45_s22, %s526_s7  ;;  %p532_p7 = scmp.lt.s32.totalorder %s526_s7, %s526_s7 }
  0x30   :  { %p533_p8 = por %p532_p7, %p531_p6 }
  0x32   :  { %p534_p9 = pnand %p533_p8, %p527_p5 }
  0x34   :  { %537 = shalt.err (!%p534_p9)
}
  0x35   :  { %50 = dma.hbm_to_vmem [thread:$0]  %s674_s3, 4096, %s45_s22, [#allocation6], %s567_s28, %s567_s28, %s568_s29  }
  0x36   :  { %560 = dma.done.wait [#allocation3], 128  }
  0x37   :  { %561 = vsyncadd [#allocation3], 4294967168 }
  0x38   :  { %562 = dma.done.wait [#allocation6], 6144  }
  0x39   :  { %563 = vsyncadd [#allocation6], 4294961152  ;;  %v573_v0 = vmov 0   ;;  %v444_v1 = vld [vmem:[#allocation5 + $0x4] ss:$8 sps:$4 sm:$0xff]   ;;  %v234_v15 = vld [vmem:[#allocation7 + $0x90] sm:$0xff] }
  0x3a   :  { %205 = vmatprep.mubr.bf16.mxu0 %v573_v0  ;;  %v446_v2 = vld [vmem:[#allocation5] ss:$8 sps:$4 sm:$0xff]   ;;  %173 = vmatprep.subr.bf16.mxu0 %v444_v1  ;;  %v447_v3 = vld [vmem:[#allocation5 + $0x14] ss:$8 sps:$4 sm:$0xff]   ;;  %v449_v4 = vld [vmem:[#allocation5 + $0x10] ss:$8 sps:$4 sm:$0xff]  }
  0x3b   :  { %174 = vmatpush1.bf16.msra.mxu0 %v446_v2  ;;  %v450_v5 = vld [vmem:[#allocation5 + $0x24] ss:$8 sps:$4 sm:$0xff]   ;;  %v452_v6 = vld [vmem:[#allocation5 + $0x20] ss:$8 sps:$4 sm:$0xff]   ;;  %v453_v7 = vld [vmem:[#allocation5 + $0x34] ss:$8 sps:$4 sm:$0xff]  }
  0x3c   :  { %175 = vmatprep.subr.bf16.mxu0 %v447_v3  ;;  %v455_v8 = vld [vmem:[#allocation5 + $0x30] ss:$8 sps:$4 sm:$0xff]   ;;  %v456_v9 = vld [vmem:[#allocation5 + $0x44] ss:$8 sps:$4 sm:$0xff]   ;;  %v458_v23 = vld [vmem:[#allocation5 + $0x40] ss:$8 sps:$4 sm:$0xff]   ;;  %v83_v3 = vlaneseq }
  0x3d   :  { %v232_v10 = vld [vmem:[#allocation7 + $0x80] sm:$0xff]  ;;  %v233_v11 = vld [vmem:[#allocation7 + $0x88] sm:$0xff]  ;;  %v235_v16 = vld [vmem:[#allocation7 + $0x98] sm:$0xff] }
  0x3e   :  { %v216_v12 = vld [vmem:[#allocation7] sm:$0xff]  ;;  %v403_v13 = vpack.c.bf16 %v233_v11, %v232_v10  ;;  %v217_v14 = vld [vmem:[#allocation7 + $0x8] sm:$0xff]  ;;  %v407_v18 = vpack.c.bf16 %v235_v16, %v234_v15  ;;  %v218_v19 = vld [vmem:[#allocation7 + $0x10] sm:$0xff] }
  0x3f   :  { %176 = vmatpush1.bf16.msra.mxu0 %v449_v4  ;;  %v405_v17 = vpack.c.bf16 %v217_v14, %v216_v12  ;;  %v219_v20 = vld [vmem:[#allocation7 + $0x18] sm:$0xff]  ;;  %v236_v21 = vld [vmem:[#allocation7 + $0xa0] sm:$0xff]  ;;  %v237_v22 = vld [vmem:[#allocation7 + $0xa8] sm:$0xff]  ;;  %v84_v4 = vshrl.u32 %v83_v3, 7 }
  0x40   :  { %177 = vmatprep.subr.bf16.mxu0 %v450_v5  ;;  %404 = vmatprep.subr.bf16.mxu1 %v403_v13  ;;  %v409_v24 = vpack.c.bf16 %v219_v20, %v218_v19  ;;  %v459_v25 = vld [vmem:[#allocation5 + $0x54] ss:$8 sps:$4 sm:$0xff]   ;;  %v411_v26 = vpack.c.bf16 %v237_v22, %v236_v21  ;;  %v220_v27 = vld [vmem:[#allocation7 + $0x20] sm:$0xff]  ;;  %v221_v28 = vld [vmem:[#allocation7 + $0x28] sm:$0xff] }
  0x41   :  { %406 = vmatpush3.bf16.msra.mxu1 %v405_v17  ;;  %v238_v29 = vld [vmem:[#allocation7 + $0xb0] sm:$0xff]  ;;  %v239_v30 = vld [vmem:[#allocation7 + $0xb8] sm:$0xff]  ;;  %v413_v32 = vpack.c.bf16 %v221_v28, %v220_v27  ;;  %v462_v33 = vld [vmem:[#allocation5 + $0x64] ss:$8 sps:$4 sm:$0xff]   ;;  %v85_v5 = vsub.s32 0, %v84_v4 }
  0x42   :  { %408 = vmatprep.subr.bf16.mxu1 %v407_v18  ;;  %v461_v31 = vld [vmem:[#allocation5 + $0x50] ss:$8 sps:$4 sm:$0xff]   ;;  %v415_v34 = vpack.c.bf16 %v239_v30, %v238_v29  ;;  %v240_v37 = vld [vmem:[#allocation7 + $0xc0] sm:$0xff]  ;;  %v241_v38 = vld [vmem:[#allocation7 + $0xc8] sm:$0xff] }
  0x43   :  { %178 = vmatpush1.bf16.msra.mxu0 %v452_v6  ;;  %v222_v35 = vld [vmem:[#allocation7 + $0x30] sm:$0xff]  ;;  %v223_v36 = vld [vmem:[#allocation7 + $0x38] sm:$0xff]  ;;  %v464_v39 = vld [vmem:[#allocation5 + $0x60] ss:$8 sps:$4 sm:$0xff]   ;;  %v419_v42 = vpack.c.bf16 %v241_v38, %v240_v37 }
  0x44   :  { %179 = vmatprep.subr.bf16.mxu0 %v453_v7  ;;  %v417_v40 = vpack.c.bf16 %v223_v36, %v222_v35  ;;  %v465_v41 = vld [vmem:[#allocation5 + $0x74] ss:$8 sps:$4 sm:$0xff]   ;;  %v224_v43 = vld [vmem:[#allocation7 + $0x40] sm:$0xff]  ;;  %v225_v44 = vld [vmem:[#allocation7 + $0x48] sm:$0xff]  ;;  %v89_v7 = vsub.s32 1, %v84_v4 }
  0x45   :  { %410 = vmatpush3.bf16.msra.mxu1 %v409_v24  ;;  %v242_v45 = vld [vmem:[#allocation7 + $0xd0] sm:$0xff]  ;;  %v243_v46 = vld [vmem:[#allocation7 + $0xd8] sm:$0xff]  ;;  %v421_v49 = vpack.c.bf16 %v225_v44, %v224_v43  ;;  %v244_v53 = vld [vmem:[#allocation7 + $0xe0] sm:$0xff] }
  0x46   :  { %412 = vmatprep.subr.bf16.mxu1 %v411_v26  ;;  %v467_v47 = vld [vmem:[#allocation5 + $0x70] ss:$8 sps:$4 sm:$0xff]   ;;  %v423_v50 = vpack.c.bf16 %v243_v46, %v242_v45  ;;  %v245_v54 = vld [vmem:[#allocation7 + $0xe8] sm:$0xff]  ;;  %v228_v58 = vld [vmem:[#allocation7 + $0x60] sm:$0xff] }
  0x47   :  { %180 = vmatpush1.bf16.msra.mxu0 %v455_v8  ;;  %v63_v48 = vld [vmem:[#allocation2] sm:$0xff]  ;;  %v226_v51 = vld [vmem:[#allocation7 + $0x50] sm:$0xff]  ;;  %v427_v57 = vpack.c.bf16 %v245_v54, %v244_v53  ;;  %v229_v59 = vld [vmem:[#allocation7 + $0x68] sm:$0xff] }
  0x48   :  { %181 = vmatprep.subr.bf16.mxu0 %v456_v9  ;;  %v227_v52 = vld [vmem:[#allocation7 + $0x58] sm:$0xff]  ;;  %v64_v55 = vpack.c.bf16 %v63_v48, %v63_v48  ;;  %v429_v60 = vpack.c.bf16 %v229_v59, %v228_v58  ;;  %v246_v61 = vld [vmem:[#allocation7 + $0xf0] sm:$0xff] }
  0x49   :  { %414 = vmatpush3.bf16.msra.mxu1 %v413_v32  ;;  %v425_v56 = vpack.c.bf16 %v227_v52, %v226_v51  ;;  %v247_v62 = vld [vmem:[#allocation7 + $0xf8] sm:$0xff]  ;;  %v230_v0 = vld [vmem:[#allocation7 + $0x70] sm:$0xff] }
  0x4a   :  { %416 = vmatprep.subr.bf16.mxu1 %v415_v34  ;;  %v431_v63 = vpack.c.bf16 %v247_v62, %v246_v61  ;;  %v231_v1 = vld [vmem:[#allocation7 + $0x78] sm:$0xff] }
  0x4b   :  { %182 = vmatpush1.bf16.msra.mxu0 %v458_v23  ;;  %v433_v2 = vpack.c.bf16 %v231_v1, %v230_v0  ;;  %v81_v6 = vld [vmem:[%s673_s2] sm:$0x3] }
  0x4c   :  { %183 = vmatprep.subr.bf16.mxu0 %v459_v25  ;;  %v86_v8 = vrot.slane %v81_v6, %v85_v5  ;;  %v90_v9 = vrot.slane %v81_v6, %v89_v7  ;;  %v366_v19 = vld [vmem:[%s675_s4] ss:$0 sm:$0xff] }
  0x4d   :  { %418 = vmatpush3.bf16.msra.mxu1 %v417_v40 }
  0x4e   :  { %420 = vmatprep.subr.bf16.mxu1 %v419_v42 }
  0x4f   :  { %184 = vmatpush1.bf16.msra.mxu0 %v461_v31 }
  0x50   :  { %185 = vmatprep.subr.bf16.mxu0 %v462_v33 }
  0x51   :  { %422 = vmatpush3.bf16.msra.mxu1 %v421_v49 }
  0x52   :  { %424 = vmatprep.subr.bf16.mxu1 %v423_v50 }
  0x53   :  { %186 = vmatpush1.bf16.msra.mxu0 %v464_v39 }
  0x54   :  { %187 = vmatprep.subr.bf16.mxu0 %v465_v41 }
  0x55   :  { %426 = vmatpush3.bf16.msra.mxu1 %v425_v56 }
  0x56   :  { %428 = vmatprep.subr.bf16.mxu1 %v427_v57 }
  0x57   :  { %188 = vmatpush1.bf16.msra.mxu0 %v467_v47 }
  0x59   :  { %430 = vmatpush3.bf16.msra.mxu1 %v429_v60 }
  0x5a   :  { %206 = vmatmul.mubr.bf16.vlgmr.msra.gmra.mrb[0].mxu0 %v64_v55  ;;  %432 = vmatprep.subr.bf16.mxu1 %v431_v63 }
  0x5d   :  { %434 = vmatpush3.bf16.msra.mxu1 %v433_v2 }
 0x12d   :  { %v207_v10 = vpop.f32.mrb[0].mxu0 }
 0x12e   :  { %v208_v11 = vadd.f32 %v207_v10, %v86_v8  ;;  %v209_v12 = vpop.f32.mrb[1].mxu0 }
 0x12f   :  { %v211_v13 = vpop.f32.mrb[2].mxu0  ;;  %v210_v14 = vadd.f32 %v209_v12, %v90_v9 }
 0x130   :  { %v212_v15 = vpop.f32.mrb[3].mxu0  ;;  %v214_v17 = vmax.f32 %v208_v11, 0.0 }
 0x131   :  { %v215_v16 = vmax.f32 %v210_v14, 0.0 }
 0x133   :  { %319 = vmatprep.mubr.f32.mxu1 %v215_v16 }
 0x134   :  { %320 = vmatmul.mubr.f32.vlgmr.msra.gmra.mrb[0].mxu1 %v214_v17 }
 0x207   :  { %v400_v18 = vpop.f32.mrb[0].mxu1 }
 0x208   :  { %v401_v20 = vpop.f32.mrb[1].mxu1 }
 0x209   :  { %v402_v21 = vadd.f32 %v401_v20, %v400_v18 }
 0x20b   :  { %v322_v22 = vadd.f32 %v402_v21, %v366_v19 }
 0x20d   :  { %v367_v23 = vmul.f32 -1.442695, %v322_v22 }
 0x20f   :  { %468 = vpow2.f32 %v367_v23 }
 0x219   :  { %v469_v24 = vpop.eup %468 }
 0x21a   :  { %v328_v25 = vadd.f32 1.0, %v469_v24 }
 0x21c   :  { %470 = vrcp.f32 %v328_v25 }
 0x226   :  { %v471_v26 = vpop.eup %470 }
 0x227   :  { %331 = vst [vmem:[#allocation8] sm:$0xff] %v471_v26 }
 0x228   :  { %336 = vsyncadd [#allocation4], 96  ;;  %s574_s2 = smov [#allocation8]  }
 0x229   :  { %s337_s10 = sshll.u32 %s574_s2, 4  ;;  %s338_s10 = int_to_ptr.vmem [resolvable:$true] %s337_s10 }
 0x22a   :  { %s538_s11 = scalar_lea.vmem %s338_s10, 32  ;;  %s542_s12 = scalar_lea.vmem %s338_s10, 128 }
 0x22b   :  { %p539_p10 = scmp.ne.s32.totalorder %s338_s10, %s538_s11  ;;  %p543_p11 = scmp.lt.s32.totalorder %s338_s10, %s338_s10 }
 0x22c   :  { %p544_p12 = scmp.lt.s32.totalorder %s542_s12, %s538_s11 }
 0x22e   :  { %p545_p13 = por %p544_p12, %p543_p11 }
 0x230   :  { %p546_p0 = pnand %p545_p13, %p539_p10 }
 0x232   :  { %549 = shalt.err (!%p546_p0)
}
 0x233   :  { %s550_s14 = scalar_lea.hbm %s676_s5, 32 }
 0x234   :  { %p551_p1 = scmp.ne.s32.totalorder %s676_s5, %s550_s14  ;;  %p554_p2 = scmp.lt.u32.totalorder %s550_s14, %s676_s5 }
 0x236   :  { %p556_p3 = pnand %p554_p2, %p551_p1 }
 0x238   :  { %559 = shalt.err (!%p556_p3)
}
 0x239   :  { %343 = dma.vmem_to_hbm [thread:$0]  %s338_s10, 32, %s676_s5, [#allocation4], %s570_s17, %s570_s17, %s571_s18  }
 0x23a   :  { %564 = dma.done.wait [#allocation4], 128  }
 0x23b   :  { %565 = vsyncadd [#allocation4], 4294967168 }
 0x23c   :  { %347 = vsyncpa [#allocation3], 1 }
 0x23d   :  { %348 = vsyncpa [#allocation6], 1 }
 0x23e   :  { %349 = vsyncpa [#allocation4], 1 }

</bundles_post_ra>
